<compile_context>
chip_gen: v5e
topology: v5e:2x2
jax: 0.10.0
libtpu: 0.0.40
codegen_flags: <defaults>
</compile_context>

<pallas_src>
import functools

import jax
import jax.numpy as jnp
from jax.experimental import pallas as pl
from jax.experimental.pallas import tpu as pltpu

_LANE = 128
_BN_EPS = 1e-5
_SMALL_BATCH = 256   # whole-batch single-block path up to this many rows
_TILE_B = 256        # default batch tile for the two-phase tiled path


# --------------------------------------------------------------------------------------
# Kernels
# --------------------------------------------------------------------------------------
def _fused_kernel(x_ref, w1_ref, gamma_ref, beta_ref, w2_ref, b2_ref, o_ref):
    """Whole-batch, single-block kernel (small B)."""
    # fc_p1 (bias dropped: cancelled exactly by training-mode BatchNorm mean subtraction)
    h = jnp.dot(x_ref[...], w1_ref[...], preferred_element_type=jnp.float32)

    # BatchNorm1d (training-mode batch stats, biased variance). Two independent
    # reductions so the XLU reduces can overlap; all statistics in f32.
    inv_n = 1.0 / h.shape[0]
    s = jnp.sum(h, axis=0, keepdims=True)
    ss = jnp.sum(h * h, axis=0, keepdims=True)
    mean = s * inv_n
    var = ss * inv_n - mean * mean
    scale = gamma_ref[...] * jax.lax.rsqrt(var + _BN_EPS)      # gamma folded into rsqrt
    shift = beta_ref[...] - mean * scale

    hn = jnp.maximum(h * scale + shift, 0.0)                   # ReLU

    # fc_p2 into a lane-dense (B, 128) block (w2/b2 zero-padded 50 -> 128).
    out = jnp.dot(hn.astype(w2_ref.dtype), w2_ref[...],
                  preferred_element_type=jnp.float32) + b2_ref[...]
    o_ref[...] = out.astype(o_ref.dtype)


def _tiled_kernel(x_ref, w1_ref, gamma_ref, beta_ref, w2_ref, b2_ref, o_ref,
                  sum_ref, sumsq_ref, scale_ref, shift_ref, *, inv_batch):
    """Two-phase batch-grid kernel.  grid = (2 phases, num batch tiles)."""
    phase = pl.program_id(0)
    step = pl.program_id(1)

    # fc_p1 for this tile (recomputed in phase 1: cheaper than round-tripping h via HBM).
    # Padded (zero) rows give h == 0 exactly (no bias), so the stats stay exact as long
    # as we divide by the true batch size.
    h = jnp.dot(x_ref[...], w1_ref[...], preferred_element_type=jnp.float32)

    @pl.when(phase == 0)
    def _accumulate_stats():
        @pl.when(step == 0)
        def _init():
            sum_ref[...] = jnp.zeros_like(sum_ref)
            sumsq_ref[...] = jnp.zeros_like(sumsq_ref)

        sum_ref[...] += jnp.sum(h, axis=0, keepdims=True)
        sumsq_ref[...] += jnp.sum(h * h, axis=0, keepdims=True)

    @pl.when(phase == 1)
    def _normalize_and_project():
        @pl.when(step == 0)
        def _finalize_stats():
            mean = sum_ref[...] * inv_batch
            var = sumsq_ref[...] * inv_batch - mean * mean
            scale = gamma_ref[...] * jax.lax.rsqrt(var + _BN_EPS)
            scale_ref[...] = scale
            shift_ref[...] = beta_ref[...] - mean * scale

        hn = jnp.maximum(h * scale_ref[...] + shift_ref[...], 0.0)
        out = jnp.dot(hn.astype(w2_ref.dtype), w2_ref[...],
                      preferred_element_type=jnp.float32) + b2_ref[...]
        o_ref[...] = out.astype(o_ref.dtype)


# --------------------------------------------------------------------------------------
# Wrapper
# --------------------------------------------------------------------------------------
def duplicate_net_forward(emb, params, *, use_bf16_mxu=True, tile_b=_TILE_B):
    """DuplicateNet.forward(emb) via Pallas.

    emb: (B, dim_emb) or (dim_emb,) float32.
    params: w1 (D,H), b1 (1,H), gamma (1,H), beta (1,H), w2 (H,50), b2 (1,50);
            linear weights stored pre-transposed as (in_features, out_features).
    """
    if emb.ndim == 1:
        # Mirrors `emb.unsqueeze(0)`.  Note: torch BatchNorm1d raises for batch size 1
        # in training mode; this path exists only for API parity.
        emb = emb[None, :]

    B, D = emb.shape
    H = params["w1"].shape[1]
    O = params["w2"].shape[1]
    O_pad = pl.cdiv(O, _LANE) * _LANE   # lane-dense output width (unmasked stores)

    mxu_dtype = jnp.bfloat16 if use_bf16_mxu else jnp.float32

    # MXU operands in mxu_dtype; BN affine params and bias stay f32.
    x = emb.astype(mxu_dtype)
    w1 = params["w1"].astype(mxu_dtype)
    w2 = jnp.pad(params["w2"].astype(jnp.float32),
                 ((0, 0), (0, O_pad - O))).astype(mxu_dtype)
    gamma = params["gamma"].astype(jnp.float32).reshape(1, H)
    beta = params["beta"].astype(jnp.float32).reshape(1, H)
    b2 = jnp.pad(params["b2"].astype(jnp.float32).reshape(1, O),
                 ((0, 0), (0, O_pad - O)))
    # params["b1"] is intentionally unused: training-mode BN cancels it exactly.

    nbytes = lambda a: int(a.size) * a.dtype.itemsize
    cost = pl.CostEstimate(
        flops=2 * B * H * (D + O_pad),
        transcendentals=H,
        bytes_accessed=(nbytes(x) + nbytes(w1) + nbytes(w2) + nbytes(gamma)
                        + nbytes(beta) + nbytes(b2) + B * O_pad * 4),
    )

    if B <= _SMALL_BATCH:
        # ---- overhead-bound regime: whole batch as one block, grid=() ----
        full = lambda shape: pl.BlockSpec(shape, lambda: (0,) * len(shape))
        out = pl.pallas_call(
            _fused_kernel,
            out_shape=jax.ShapeDtypeStruct((B, O_pad), jnp.float32),
            grid=(),
            in_specs=[
                full((B, D)),       # emb
                full((D, H)),       # w1
                full((1, H)),       # gamma
                full((1, H)),       # beta
                full((H, O_pad)),   # w2 (lane-padded)
                full((1, O_pad)),   # b2 (lane-padded)
            ],
            out_specs=full((B, O_pad)),
            cost_estimate=cost,
        )(x, w1, gamma, beta, w2, b2)
        return out[:, :O]

    # ---- large batch: two-phase batch grid with VMEM-resident weights ----
    nb = pl.cdiv(B, tile_b)
    B_pad = nb * tile_b
    if B_pad != B:
        # Zero-padded rows contribute exactly 0 to sum/sumsq (no fc_p1 bias in-kernel),
        # so the statistics stay exact with the true-B divisor.
        x = jnp.pad(x, ((0, B_pad - B), (0, 0)))

    kernel = functools.partial(_tiled_kernel, inv_batch=1.0 / B)
    out = pl.pallas_call(
        kernel,
        out_shape=jax.ShapeDtypeStruct((B_pad, O_pad), jnp.float32),
        grid=(2, nb),
        in_specs=[
            pl.BlockSpec((tile_b, D), lambda p, i: (i, 0)),    # emb tile (per step)
            pl.BlockSpec((D, H), lambda p, i: (0, 0)),         # w1   (VMEM-resident)
            pl.BlockSpec((1, H), lambda p, i: (0, 0)),         # gamma
            pl.BlockSpec((1, H), lambda p, i: (0, 0)),         # beta
            pl.BlockSpec((H, O_pad), lambda p, i: (0, 0)),     # w2
            pl.BlockSpec((1, O_pad), lambda p, i: (0, 0)),     # b2
        ],
        # Phase 0 parks the output on block 0 (never written there before phase 1
        # rewrites it), so output writeback happens only once, during phase 1.
        out_specs=pl.BlockSpec((tile_b, O_pad), lambda p, i: (p * i, 0)),
        scratch_shapes=[
            pltpu.VMEM((1, H), jnp.float32),   # sum
            pltpu.VMEM((1, H), jnp.float32),   # sum of squares
            pltpu.VMEM((1, H), jnp.float32),   # folded BN scale
            pltpu.VMEM((1, H), jnp.float32),   # folded BN shift
        ],
        compiler_params=pltpu.CompilerParams(
            dimension_semantics=("arbitrary", "arbitrary")),
        cost_estimate=cost,
    )(x, w1, gamma, beta, w2, b2)
    return out[:B, :O]


def init_params(key, dim_emb, hidden_size=128, out_dim=50):
    """Parameter init mimicking torch.nn.Linear's U(-1/sqrt(fan_in), 1/sqrt(fan_in))."""
    k1, k2, k3, k4 = jax.random.split(key, 4)
    bound1 = 1.0 / jnp.sqrt(dim_emb)
    bound2 = 1.0 / jnp.sqrt(hidden_size)
    return {
        # stored as (in, out), i.e. the transpose of torch's (out, in) weight
        "w1": jax.random.uniform(k1, (dim_emb, hidden_size), jnp.float32, -bound1, bound1),
        "b1": jax.random.uniform(k2, (1, hidden_size), jnp.float32, -bound1, bound1),
        "gamma": jnp.ones((1, hidden_size), jnp.float32),   # BatchNorm1d weight
        "beta": jnp.zeros((1, hidden_size), jnp.float32),   # BatchNorm1d bias
        "w2": jax.random.uniform(k3, (hidden_size, out_dim), jnp.float32, -bound2, bound2),
        "b2": jax.random.uniform(k4, (1, out_dim), jnp.float32, -bound2, bound2),
    }


if __name__ == "__main__":
    key = jax.random.PRNGKey(0)
    k_param, k_x1, k_x2 = jax.random.split(key, 3)

    DIM_EMB, HIDDEN, OUT = 32, 128, 50
    params = init_params(k_param, DIM_EMB, HIDDEN, OUT)

    def reference(e):
        # Original math (including the fc_p1 bias, which the kernel drops because
        # training-mode BatchNorm cancels it exactly).
        h = e @ params["w1"] + params["b1"]
        mean = h.mean(0, keepdims=True)
        var = ((h - mean) ** 2).mean(0, keepdims=True)
        h = (h - mean) / jnp.sqrt(var + _BN_EPS) * params["gamma"] + params["beta"]
        return jnp.maximum(h, 0.0) @ params["w2"] + params["b2"]

    # ---- small batch -> single-block kernel ----
    B1 = 8
    emb_small = jax.random.normal(k_x1, (B1, DIM_EMB), jnp.float32)
    ref_small = reference(emb_small)
    out_small_f32 = jax.block_until_ready(
        duplicate_net_forward(emb_small, params, use_bf16_mxu=False))
    out_small_bf16 = jax.block_until_ready(duplicate_net_forward(emb_small, params))
    assert out_small_f32.shape == (B1, OUT)
    assert jnp.max(jnp.abs(out_small_f32 - ref_small)) < 1e-4       # exact-semantics path
    assert jnp.max(jnp.abs(out_small_bf16 - ref_small)) < 2e-2      # bf16 MXU operands

    # ---- large batch -> two-phase batch-grid kernel (exercises a padded last tile) ----
    B2 = 300
    emb_big = jax.random.normal(k_x2, (B2, DIM_EMB), jnp.float32)
    ref_big = reference(emb_big)
    out_big_f32 = jax.block_until_ready(
        duplicate_net_forward(emb_big, params, use_bf16_mxu=False, tile_b=128))
    out_big_bf16 = jax.block_until_ready(
        duplicate_net_forward(emb_big, params, tile_b=128))
    assert out_big_f32.shape == (B2, OUT)
    assert jnp.max(jnp.abs(out_big_f32 - ref_big)) < 1e-4
    assert jnp.max(jnp.abs(out_big_bf16 - ref_big)) < 2e-2

    print("KERNEL_OK")
</pallas_src>

<mosaic_0001>
module attributes {stable_mosaic.version = 11 : i64} {
  func.func @_fused_kernel(%arg0: memref<8x32xf32, #tpu.memory_space<vmem>>, %arg1: memref<32x128xf32, #tpu.memory_space<vmem>>, %arg2: memref<1x128xf32, #tpu.memory_space<vmem>>, %arg3: memref<1x128xf32, #tpu.memory_space<vmem>>, %arg4: memref<128x128xf32, #tpu.memory_space<vmem>>, %arg5: memref<1x128xf32, #tpu.memory_space<vmem>>, %arg6: memref<8x128xf32, #tpu.memory_space<vmem>>) attributes {dimension_semantics = [], scalar_prefetch = 0 : i64, scratch_operands = 0 : i64, tpu.core_type = #tpu.core_type<tc>} {
    %c0 = arith.constant 0 : index
    %c0_0 = arith.constant 0 : index
    %0 = vector.load %arg0[%c0, %c0_0] : memref<8x32xf32, #tpu.memory_space<vmem>>, vector<8x32xf32>
    %c0_1 = arith.constant 0 : index
    %c0_2 = arith.constant 0 : index
    %1 = vector.load %arg1[%c0_1, %c0_2] : memref<32x128xf32, #tpu.memory_space<vmem>>, vector<32x128xf32>
    %cst = arith.constant dense<0.000000e+00> : vector<8x128xf32>
    %2 = tpu.matmul %0, %1, %cst {dimension_numbers = #tpu.dot_dimension_numbers<[1], [0], [0], [1], [0, 0, 1, 1], [], []>} : vector<8x32xf32>, vector<32x128xf32>, vector<8x128xf32> -> vector<8x128xf32>
    %cst_3 = arith.constant dense<0.000000e+00> : vector<128xf32>
    %3 = vector.multi_reduction <add>, %2, %cst_3 [0] : vector<8x128xf32> to vector<128xf32>
    %4 = vector.shape_cast %3 : vector<128xf32> to vector<1x128xf32>
    %5 = arith.mulf %2, %2 : vector<8x128xf32>
    %cst_4 = arith.constant dense<0.000000e+00> : vector<128xf32>
    %6 = vector.multi_reduction <add>, %5, %cst_4 [0] : vector<8x128xf32> to vector<128xf32>
    %7 = vector.shape_cast %6 : vector<128xf32> to vector<1x128xf32>
    %cst_5 = arith.constant 1.250000e-01 : f32
    %8 = vector.broadcast %cst_5 : f32 to vector<1x128xf32>
    %9 = arith.mulf %4, %8 : vector<1x128xf32>
    %cst_6 = arith.constant 1.250000e-01 : f32
    %10 = vector.broadcast %cst_6 : f32 to vector<1x128xf32>
    %11 = arith.mulf %7, %10 : vector<1x128xf32>
    %12 = arith.mulf %9, %9 : vector<1x128xf32>
    %13 = arith.subf %11, %12 : vector<1x128xf32>
    %c0_7 = arith.constant 0 : index
    %c0_8 = arith.constant 0 : index
    %14 = vector.load %arg2[%c0_7, %c0_8] : memref<1x128xf32, #tpu.memory_space<vmem>>, vector<1x128xf32>
    %cst_9 = arith.constant 9.99999974E-6 : f32
    %15 = vector.broadcast %cst_9 : f32 to vector<1x128xf32>
    %16 = arith.addf %13, %15 : vector<1x128xf32>
    %17 = math.rsqrt %16 : vector<1x128xf32>
    %18 = arith.mulf %14, %17 : vector<1x128xf32>
    %c0_10 = arith.constant 0 : index
    %c0_11 = arith.constant 0 : index
    %19 = vector.load %arg3[%c0_10, %c0_11] : memref<1x128xf32, #tpu.memory_space<vmem>>, vector<1x128xf32>
    %20 = arith.mulf %9, %18 : vector<1x128xf32>
    %21 = arith.subf %19, %20 : vector<1x128xf32>
    %22 = vector.broadcast %18 : vector<1x128xf32> to vector<8x128xf32>
    %23 = arith.mulf %2, %22 : vector<8x128xf32>
    %24 = vector.broadcast %21 : vector<1x128xf32> to vector<8x128xf32>
    %25 = arith.addf %23, %24 : vector<8x128xf32>
    %cst_12 = arith.constant 0.000000e+00 : f32
    %26 = vector.broadcast %cst_12 : f32 to vector<8x128xf32>
    %27 = arith.maximumf %25, %26 : vector<8x128xf32>
    %c0_13 = arith.constant 0 : index
    %c0_14 = arith.constant 0 : index
    %28 = vector.load %arg4[%c0_13, %c0_14] : memref<128x128xf32, #tpu.memory_space<vmem>>, vector<128x128xf32>
    %cst_15 = arith.constant dense<0.000000e+00> : vector<8x128xf32>
    %29 = tpu.matmul %27, %28, %cst_15 {dimension_numbers = #tpu.dot_dimension_numbers<[1], [0], [0], [1], [0, 0, 1, 1], [], []>} : vector<8x128xf32>, vector<128x128xf32>, vector<8x128xf32> -> vector<8x128xf32>
    %c0_16 = arith.constant 0 : index
    %c0_17 = arith.constant 0 : index
    %30 = vector.load %arg5[%c0_16, %c0_17] : memref<1x128xf32, #tpu.memory_space<vmem>>, vector<1x128xf32>
    %31 = vector.broadcast %30 : vector<1x128xf32> to vector<8x128xf32>
    %32 = arith.addf %29, %31 : vector<8x128xf32>
    %c0_18 = arith.constant 0 : index
    %c0_19 = arith.constant 0 : index
    %33 = vector.load %arg6[%c0_18, %c0_19] : memref<8x128xf32, #tpu.memory_space<vmem>>, vector<8x128xf32>
    tpu.vector_store %arg6[%c0_18, %c0_19], %32 {strides = array<i32>} : memref<8x128xf32, #tpu.memory_space<vmem>>, vector<8x128xf32>,
    return
  }
}

</mosaic_0001>

<bundles_post_ra>
// kernel: tpu_custom_call.1
= control target key start
LH: loop header
LB: loop body
LE: loop exit
PB: predicated region body
PF: predicated region fallthrough
CT: control target
= control target key end

     0   :  { %11 = vsyncpa [#allocation3], 0  ;;  %s373_s0 = inlined_call_operand.hbm [shape: f32[8,32], index: 0, kind: input, shape index: {}]   ;;  %s374_s1 = inlined_call_operand.hbm [shape: f32[32,128], index: 1, kind: input, shape index: {}]   ;;  %s375_s2 = inlined_call_operand.vmem [shape: f32[1,128], index: 2, kind: input, shape index: {}]   ;;  %s376_s3 = inlined_call_operand.vmem [shape: f32[1,128], index: 3, kind: input, shape index: {}]   ;;  %s377_s4 = inlined_call_operand.hbm [shape: f32[128,128], index: 4, kind: input, shape index: {}]   ;;  %s378_s5 = inlined_call_operand.vmem [shape: f32[1,128], index: 5, kind: input, shape index: {}]   ;;  %s379_s6 = inlined_call_operand.hbm [shape: f32[8,128], index: 6, kind: output, shape index: {}]  }
   0x1   :  { %12 = vsyncpa [#allocation6], 0  ;;  %s29_s23 = sshll.u32 %s374_s1, 4  ;;  %s30_s23 = int_to_ptr.hbm [resolvable:$true] %s29_s23 }
   0x2   :  { %13 = vsyncpa [#allocation4], 0  ;;  %s311_s24 = smov [#allocation5]   ;;  %s19_s28 = sshll.u32 %s373_s0, 4  ;;  %s20_s28 = int_to_ptr.hbm [resolvable:$true] %s19_s28 }
   0x3   :  { %s31_s25 = sshll.u32 %s311_s24, 4  ;;  %s312_s29 = smov 128   ;;  %s32_s25 = int_to_ptr.vmem [resolvable:$true] %s31_s25 }
   0x4   :  { %s313_s30 = smov 8   ;;  %s314_s7 = smov [#allocation2]  }
   0x5   :  { %37 = dma.hbm_to_vmem [thread:$0]  %s30_s23, 512, %s32_s25, [#allocation6], %s312_s29, %s312_s29, %s313_s30  }
   0x6   :  { %s21_s8 = sshll.u32 %s314_s7, 4  ;;  %s46_s11 = sshll.u32 %s377_s4, 4  ;;  %s22_s8 = int_to_ptr.vmem [resolvable:$true] %s21_s8  ;;  %s47_s11 = int_to_ptr.hbm [resolvable:$true] %s46_s11 }
   0x7   :  { %24 = dma.hbm_to_vmem [thread:$0]  %s20_s28, 128, %s22_s8, [#allocation3]  }
   0x8   :  { %s315_s1 = smov [#allocation7]  }
   0x9   :  { %s48_s12 = sshll.u32 %s315_s1, 4  ;;  %s49_s12 = int_to_ptr.vmem [resolvable:$true] %s48_s12 }
   0xa   :  { %54 = dma.hbm_to_vmem [thread:$0]  %s47_s11, 2048, %s49_s12, [#allocation6], %s312_s29, %s312_s29, %s313_s30  }
   0xb   :  { %305 = dma.done.wait [#allocation3], 128  }
   0xc   :  { %306 = vsyncadd [#allocation3], 4294967168 }
   0xd   :  { %307 = dma.done.wait [#allocation6], 2560  }
   0xe   :  { %308 = vsyncadd [#allocation6], 4294964736  ;;  %v73_v0 = vld [vmem:[#allocation5 + $0x18] sm:$0xff]  ;;  %v72_v1 = vld [vmem:[#allocation5 + $0x10] sm:$0xff]  ;;  %vm74_vm0 = vcmask 261120   ;;  %s188_s20 = sshll.u32 %s379_s6, 4  ;;  %s189_s20 = int_to_ptr.hbm [resolvable:$true] %s188_s20 }
   0xf   :  { %90 = vmatpush.msra.mxu0 %v73_v0  ;;  %v71_v2 = vld [vmem:[#allocation5 + $0x8] sm:$0xff]  ;;  %v70_v3 = vld [vmem:[#allocation5] sm:$0xff]  ;;  %v69_v4 = vld [vmem:[#allocation2] sm:$0xff] }
  0x10   :  { %v155_v5 = vld [vmem:[#allocation7 + $0x78] sm:$0xff]  ;;  %v154_v6 = vld [vmem:[#allocation7 + $0x70] sm:$0xff]  ;;  %v153_v7 = vld [vmem:[#allocation7 + $0x68] sm:$0xff] }
  0x11   :  { %91 = vmatpush.msra.mxu0 %v72_v1  ;;  %160 = vmatpush.msra.mxu1 %v155_v5  ;;  %v152_v8 = vld [vmem:[#allocation7 + $0x60] sm:$0xff]  ;;  %v151_v9 = vld [vmem:[#allocation7 + $0x58] sm:$0xff]  ;;  %v150_v10 = vld [vmem:[#allocation7 + $0x50] sm:$0xff] }
  0x12   :  { %v149_v11 = vld [vmem:[#allocation7 + $0x48] sm:$0xff]  ;;  %v148_v15 = vld [vmem:[#allocation7 + $0x40] sm:$0xff]  ;;  %v147_v18 = vld [vmem:[#allocation7 + $0x38] sm:$0xff] }
  0x13   :  { %92 = vmatpush.msra.mxu0 %v71_v2  ;;  %161 = vmatpush.msra.mxu1 %v154_v6  ;;  %v146_v21 = vld [vmem:[#allocation7 + $0x30] sm:$0xff]  ;;  %v145_v24 = vld [vmem:[#allocation7 + $0x28] sm:$0xff]  ;;  %v144_v27 = vld [vmem:[#allocation7 + $0x20] sm:$0xff] }
  0x14   :  { %v143_v30 = vld [vmem:[#allocation7 + $0x18] sm:$0xff]  ;;  %v142_v31 = vld [vmem:[#allocation7 + $0x10] sm:$0xff]  ;;  %v141_v34 = vld [vmem:[#allocation7 + $0x8] sm:$0xff] }
  0x15   :  { %93 = vmatpush.msra.mxu0 %v70_v3  ;;  %162 = vmatpush.msra.mxu1 %v153_v7  ;;  %v140_v37 = vld [vmem:[#allocation7] sm:$0xff]  ;;  %v115_v45 = vld [vmem:[%s375_s2] sm:$0x1]  ;;  %s316_s2 = smov [#allocation8]  }
  0x16   :  { %199 = vmatmul.msk.f32.vlgmr.msra.gmra.mxu0 %vm74_vm0, %v69_v4  ;;  %v128_v49 = vld [vmem:[%s376_s3] sm:$0x1]  ;;  %s186_s17 = sshll.u32 %s316_s2, 4  ;;  %s187_s17 = int_to_ptr.vmem [resolvable:$true] %s186_s17 }
  0x17   :  { %163 = vmatpush.msra.mxu1 %v152_v8  ;;  %v206_v57 = vld [vmem:[%s378_s5] ss:$0 sm:$0xff] }
  0x19   :  { %164 = vmatpush.msra.mxu1 %v151_v9 }
  0x1b   :  { %165 = vmatpush.msra.mxu1 %v150_v10 }
  0x1d   :  { %166 = vmatpush.msra.mxu1 %v149_v11 }
  0x1f   :  { %167 = vmatpush.msra.mxu1 %v148_v15 }
  0x21   :  { %168 = vmatpush.msra.mxu1 %v147_v18 }
  0x23   :  { %169 = vmatpush.msra.mxu1 %v146_v21 }
  0x25   :  { %170 = vmatpush.msra.mxu1 %v145_v24 }
  0x27   :  { %171 = vmatpush.msra.mxu1 %v144_v27 }
  0x29   :  { %172 = vmatpush.msra.mxu1 %v143_v30 }
  0x2b   :  { %173 = vmatpush.msra.mxu1 %v142_v31 }
  0x2d   :  { %174 = vmatpush.msra.mxu1 %v141_v34 }
  0x2f   :  { %175 = vmatpush.msra.mxu1 %v140_v37 }
  0x93   :  { %v95_v12 = vpop.f32.mrf.mxu0 }
  0x94   :  { %v98_v13 = vrot.slane %v95_v12, 4  ;;  %v104_v14 = vmul.f32 %v95_v12, %v95_v12 }
  0x96   :  { %v99_v16 = vadd.f32 %v98_v13, %v95_v12  ;;  %v105_v17 = vrot.slane %v104_v14, 4 }
  0x98   :  { %v100_v19 = vrot.slane %v99_v16, 2  ;;  %v106_v20 = vadd.f32 %v105_v17, %v104_v14 }
  0x9a   :  { %v101_v22 = vadd.f32 %v100_v19, %v99_v16  ;;  %v107_v23 = vrot.slane %v106_v20, 2 }
  0x9c   :  { %v102_v25 = vrot.slane %v101_v22, 1  ;;  %v108_v26 = vadd.f32 %v107_v23, %v106_v20 }
  0x9e   :  { %v103_v28 = vadd.f32 %v102_v25, %v101_v22  ;;  %v109_v29 = vrot.slane %v108_v26, 1 }
  0xa0   :  { %v110_v32 = vadd.f32 %v109_v29, %v108_v26  ;;  %v111_v33 = vmul.f32 0.125, %v103_v28 }
  0xa2   :  { %v112_v35 = vmul.f32 0.125, %v110_v32  ;;  %v113_v36 = vmul.f32 %v111_v33, %v111_v33 }
  0xa4   :  { %v114_v38 = vsub.f32 %v112_v35, %v113_v36 }
  0xa6   :  { %v116_v39 = vadd.f32 1e-05, %v114_v38 }
  0xa8   :  { %207 = vrsqrt.f32 %v116_v39  ;;  %vm123_vm2 = vweird.f32 %v116_v39 }
  0xae   :  { %v208_v40 = vpop.eup %207 }
  0xaf   :  { %v118_v41 = vmul.f32 %v208_v40, %v116_v39  ;;  %vm124_vm1 = vweird.f32 %v208_v40 }
  0xb0   :  { %vm125_vm3 = vmor %vm123_vm2, %vm124_vm1 }
  0xb1   :  { %v119_v42 = vmul.f32 %v208_v40, %v118_v41 }
  0xb3   :  { %v120_v43 = vmul.f32 0.5, %v119_v42 }
  0xb5   :  { %v121_v44 = vsub.f32 1.5, %v120_v43 }
  0xb7   :  { %v122_v46 = vmul.f32 %v208_v40, %v121_v44 }
  0xb9   :  { %v126_v47 = vsel %vm125_vm3, %v208_v40, %v122_v46 }
  0xba   :  { %v127_v48 = vmul.f32 %v126_v47, %v115_v45 }
  0xbc   :  { %v132_v50 = vperm.slane %v127_v48, 0  ;;  %v129_v51 = vmul.f32 %v127_v48, %v111_v33 }
  0xbe   :  { %v130_v52 = vsub.f32 %v128_v49, %v129_v51  ;;  %v134_v53 = vmul.f32 %v132_v50, %v95_v12 }
  0xc0   :  { %v136_v54 = vperm.slane %v130_v52, 0 }
  0xc2   :  { %v138_v55 = vadd.f32 %v136_v54, %v134_v53 }
  0xc4   :  { %v139_v56 = vmax.f32 %v138_v55, 0.0 }
  0xc6   :  { %176 = vmatmul.f32.vlgmr.msra.gmra.mxu1 %v139_v56 }
 0x143   :  { %v177_v58 = vpop.f32.mrf.mxu1 }
 0x144   :  { %v178_v59 = vadd.f32 %v206_v57, %v177_v58 }
 0x146   :  { %180 = vst [vmem:[#allocation8] sm:$0xff] %v178_v59 }
 0x147   :  { %191 = dma.vmem_to_hbm [thread:$0]  %s187_s17, 128, %s189_s20, [#allocation4]  }
 0x148   :  { %309 = dma.done.wait [#allocation4], 128  }
 0x149   :  { %310 = vsyncadd [#allocation4], 4294967168 }
 0x14a   :  { %196 = vsyncpa [#allocation3], 1 }
 0x14b   :  { %197 = vsyncpa [#allocation6], 1 }
 0x14c   :  { %198 = vsyncpa [#allocation4], 1 }

</bundles_post_ra>
